<compile_context>
chip_gen: v5e
topology: v5e:2x2
jax: 0.10.0
libtpu: 0.0.40
codegen_flags: <defaults>
</compile_context>

<pallas_src>
import functools

import jax
import jax.numpy as jnp
import numpy as np
from jax.experimental import pallas as pl
from jax.experimental.pallas import tpu as pltpu

_LANE = 128      # lane width / MXU contraction quantum
_SUBLANE = 16    # bf16 sublane quantum


def _round_up(x, m):
    return ((x + m - 1) // m) * m


def _cdiv(a, b):
    return -(-a // b)


def _skipgram_kernel(center_ref, outside_ref, table_ref, lse_ref, pos_ref,
                     m_ref, l_ref, *, vt, n_vps, v_real):
    s = pl.program_id(0)   # vocab split ("parallel": one per TensorCore on v7x)
    v = pl.program_id(1)   # streamed vocab tiles within the split ("arbitrary")

    @pl.when(v == 0)
    def _init():
        m_ref[...] = jnp.full_like(m_ref, -jnp.inf)
        l_ref[...] = jnp.zeros_like(l_ref)

    center = center_ref[...]                                    # (Bp, Ep) bf16

    # scores[b, j] = center_b . table[:, j]  -- MXU, bf16 in / f32 accumulate.
    # rhs contracts on dim 0, so the streamed tile feeds the MXU without an XLU
    # transpose and the scores' lane axis is the vocab axis (lane-dense exp/max/sum).
    scores = jax.lax.dot_general(
        center, table_ref[...],
        dimension_numbers=(((1,), (0,)), ((), ())),
        preferred_element_type=jnp.float32)                     # (Bp, vt) f32

    # Mask the zero-padded vocab tail (global column >= v_real) to -inf.
    tile = s * n_vps + v
    col = tile * vt + jax.lax.broadcasted_iota(jnp.int32, scores.shape, 1)
    scores = jnp.where(col < v_real, scores, -jnp.inf)

    # Online (streaming) log-sum-exp over the vocab axis.
    m_prev = m_ref[...]                                                   # (Bp, 1)
    m_new = jnp.maximum(m_prev, jnp.max(scores, axis=-1, keepdims=True))
    # Defensive clamp: a fully padded tile would otherwise give -inf - -inf = NaN.
    m_new = jnp.maximum(m_new, jnp.float32(-1e30))
    l_ref[...] = l_ref[...] * jnp.exp(m_prev - m_new) + jnp.sum(
        jnp.exp(scores - m_new), axis=-1, keepdims=True)
    m_ref[...] = m_new

    @pl.when(v == n_vps - 1)
    def _finalize():
        # Partial logsumexp over this split's slice of the vocab.
        lse_ref[...] = (m_ref[...] + jnp.log(l_ref[...]))[None]          # (1, Bp, 1)
        # log(top) is just the raw dot product (exp/log round-trip eliminated).
        pos = jnp.sum(outside_ref[...].astype(jnp.float32)
                      * center.astype(jnp.float32), axis=-1, keepdims=True)
        pos_ref[...] = pos[None]


def _vocab_is_identity(all_vocabs_idx, voc_size):
    """True iff every row of all_vocabs is arange(voc_size) (concrete values only)."""
    try:
        av = np.asarray(all_vocabs_idx)          # raises for traced values
    except Exception:
        return False
    if av.ndim != 2 or av.shape[1] != voc_size:
        return False
    return bool((av == np.arange(voc_size, dtype=av.dtype)[None, :]).all())


def skipgram_loss(embedding_center, center_idx, outside_idx, all_vocabs_idx,
                  *, v_tile=None):
    """center_idx: (B,1) int32, outside_idx: (B,1) int32, all_vocabs_idx: (B,V) int32."""
    B = center_idx.shape[0]
    V = all_vocabs_idx.shape[1]
    voc_size, E = embedding_center.shape

    # ---- vocab table: avoid redundant HBM copies -----------------------------
    if _vocab_is_identity(all_vocabs_idx, voc_size):
        table_src = embedding_center                       # (V, E): skip the gather
    else:
        # TODO(synk): assumes every batch row indexes the same vocab list; a per-batch
        # (B, V, E) gather path would be needed if that invariant ever breaks.
        table_src = jnp.take(embedding_center, all_vocabs_idx[0], axis=0)

    # ---- tile sizes ----------------------------------------------------------
    Ep = _round_up(E, _LANE)
    Bp = _round_up(max(B, _SUBLANE), _SUBLANE)
    # TODO(synk): if production B grows large, additionally tile B as a leading grid axis.

    try:
        vmem_cap = int(pltpu.get_tpu_info().vmem_capacity_bytes)
    except Exception:
        vmem_cap = 64 * 1024 * 1024
    # ~48 MiB on every generation: leaves headroom on v7x (64 MiB/TC) and is
    # plenty for multi-MiB double-buffered tiles on v5e/v6e.
    vmem_limit = int(min(vmem_cap * 3 // 4, 48 * 1024 * 1024))

    bytes_bf16 = 2
    if v_tile is not None:
        vt = min(_round_up(max(int(v_tile), _LANE), _LANE), _round_up(V, _LANE))
    else:
        # Target ~4 MiB streamed tiles so the DMA dwarfs the ~0.35us per-step overhead
        # (dominant on v7x @ 3.2 TB/s); cap so two buffers + scores + internal scratch
        # stay well under the VMEM limit.
        table_budget = vmem_limit // 3
        vt_cap = max(_LANE, (table_budget // (2 * Ep * bytes_bf16)) // _LANE * _LANE)
        vt_target = max(_LANE, ((4 << 20) // (Ep * bytes_bf16)) // _LANE * _LANE)
        vt = min(vt_target, vt_cap, _round_up(V, _LANE))
        # Re-balance vt so the tail tile is not mostly padding (same tile count).
        vt = min(vt, _round_up(_cdiv(V, _cdiv(V, vt)), _LANE))

    n_tiles = _cdiv(V, vt)
    # v7x has two TensorCores: split the vocab tiles across a "parallel" grid axis.
    n_split = 2 if n_tiles >= 2 else 1
    n_vps = _cdiv(n_tiles, n_split)            # tiles per split
    Vp = n_split * n_vps * vt                  # padded vocab (tail masked in-kernel)

    # ---- cast / pad / transpose folded into the single bf16 copy ------------
    center_emb = jnp.take(embedding_center, center_idx.reshape(-1), axis=0)
    outside_emb = jnp.take(embedding_center, outside_idx.reshape(-1), axis=0)
    if Bp != B or Ep != E:
        center_emb = jnp.pad(center_emb, ((0, Bp - B), (0, Ep - E)))
        outside_emb = jnp.pad(outside_emb, ((0, Bp - B), (0, Ep - E)))
    center_emb = center_emb.astype(jnp.bfloat16)
    outside_emb = outside_emb.astype(jnp.bfloat16)

    table_t = table_src.T.astype(jnp.bfloat16)                 # (E, V) bf16
    if Ep != E or Vp != V:
        table_t = jnp.pad(table_t, ((0, Ep - E), (0, Vp - V)))

    kernel = functools.partial(_skipgram_kernel, vt=vt, n_vps=n_vps, v_real=V)

    lse_parts, pos_parts = pl.pallas_call(
        kernel,
        out_shape=(
            jax.ShapeDtypeStruct((n_split, Bp, 1), jnp.float32),
            jax.ShapeDtypeStruct((n_split, Bp, 1), jnp.float32),
        ),
        grid_spec=pltpu.PrefetchScalarGridSpec(
            num_scalar_prefetch=0,
            grid=(n_split, n_vps),
            in_specs=[
                pl.BlockSpec((Bp, Ep), lambda s, v: (0, 0)),               # center (resident)
                pl.BlockSpec((Bp, Ep), lambda s, v: (0, 0)),               # outside (resident)
                pl.BlockSpec((Ep, vt), lambda s, v: (0, s * n_vps + v)),   # streamed table tile
            ],
            out_specs=(
                pl.BlockSpec((1, Bp, 1), lambda s, v: (s, 0, 0)),
                pl.BlockSpec((1, Bp, 1), lambda s, v: (s, 0, 0)),
            ),
            scratch_shapes=[
                pltpu.VMEM((Bp, 1), jnp.float32),   # running max  m
                pltpu.VMEM((Bp, 1), jnp.float32),   # running sum  l
            ],
        ),
        compiler_params=pltpu.CompilerParams(
            dimension_semantics=("parallel", "arbitrary"),
            vmem_limit_bytes=vmem_limit,
        ),
    )(center_emb, outside_emb, table_t)

    # Tiny glue: merge per-split partial logsumexps and take the batch means
    # over the real (unpadded) rows.
    lse = lse_parts[:, :B, 0]                      # (n_split, B)
    pos = pos_parts[0, :B, 0]                      # (B,)
    m = jnp.max(lse, axis=0)
    log_z = m + jnp.log(jnp.sum(jnp.exp(lse - m[None, :]), axis=0))
    # mean_{i,j} log(top_i / Z_j) == mean_i pos_i - mean_j log Z_j
    return jnp.mean(log_z) - jnp.mean(pos)


def skipgram_loss_ref(embedding_center, center_idx, outside_idx, all_vocabs_idx):
    """Plain-JAX reference mirroring the PyTorch code line-by-line (incl. its broadcast)."""
    ce = embedding_center[center_idx[:, 0]]        # (B, E)
    oe = embedding_center[outside_idx[:, 0]]       # (B, E)
    ae = embedding_center[all_vocabs_idx]          # (B, V, E)
    top = jnp.exp(jnp.einsum("be,be->b", oe, ce))[:, None]      # (B, 1)
    lower = jnp.einsum("bve,be->bv", ae, ce)                    # (B, V)
    lower_sum = jnp.sum(jnp.exp(lower), axis=1)                 # (B,)
    return -jnp.mean(jnp.log(top / lower_sum))                  # (B,1)/(B,) -> (B,B)


def _run_case(key, voc_size, emb_size, batch, scale=1.0, v_tile=None):
    k_emb, k_center, k_outside = jax.random.split(key, 3)
    # nn.Embedding default init ~ N(0, 1) (optionally scaled for the larger case).
    embedding_center = scale * jax.random.normal(k_emb, (voc_size, emb_size), jnp.float32)
    # embedding_outside exists in __init__ but is never used in forward -> omitted.
    center = jax.random.randint(k_center, (batch, 1), 0, voc_size, jnp.int32)
    outside = jax.random.randint(k_outside, (batch, 1), 0, voc_size, jnp.int32)
    all_vocabs = jnp.tile(jnp.arange(voc_size, dtype=jnp.int32)[None, :], (batch, 1))

    loss = jax.block_until_ready(
        skipgram_loss(embedding_center, center, outside, all_vocabs, v_tile=v_tile))

    # Exact-semantics f32 reference, plus a bf16-input reference (the kernel streams
    # bf16 embeddings with f32 accumulation -> looser tolerance vs the f32 reference).
    ref_f32 = skipgram_loss_ref(embedding_center, center, outside, all_vocabs)
    emb_q = embedding_center.astype(jnp.bfloat16).astype(jnp.float32)
    ref_q = skipgram_loss_ref(emb_q, center, outside, all_vocabs)

    tight = 5e-3 * (1.0 + abs(float(ref_q)))
    loose = 5e-2 * (1.0 + abs(float(ref_f32)))
    assert abs(float(loss) - float(ref_q)) < tight, (float(loss), float(ref_q))
    assert abs(float(loss) - float(ref_f32)) < loose, (float(loss), float(ref_f32))
    return float(loss)


if __name__ == "__main__":
    key = jax.random.PRNGKey(0)
    k1, k2 = jax.random.split(key)

    # Small shapes matching the module (batch=2, voc_size=8, emb_size=32).
    _run_case(k1, voc_size=8, emb_size=32, batch=2)

    # Exercise multi-tile streaming, the masked vocab tail, a fully padded tile,
    # and the two-way vocab split (v_tile forces several tiles).
    _run_case(k2, voc_size=300, emb_size=64, batch=3, scale=0.25, v_tile=128)

    print("KERNEL_OK")
</pallas_src>

<mosaic_0001>
module attributes {stable_mosaic.version = 11 : i64} {
  func.func @_skipgram_kernel(%arg0: i32, %arg1: i32, %arg2: memref<16x128xbf16, #tpu.memory_space<vmem>>, %arg3: memref<16x128xbf16, #tpu.memory_space<vmem>>, %arg4: memref<128x128xbf16, #tpu.memory_space<vmem>>, %arg5: memref<1x16x1xf32, #tpu.memory_space<vmem>>, %arg6: memref<1x16x1xf32, #tpu.memory_space<vmem>>, %arg7: memref<16x1xf32, #tpu.memory_space<vmem>>, %arg8: memref<16x1xf32, #tpu.memory_space<vmem>>) attributes {dimension_semantics = [#tpu.dimension_semantics<parallel>, #tpu.dimension_semantics<arbitrary>], iteration_bounds = array<i64: 1, 1>, scalar_prefetch = 0 : i64, scratch_operands = 2 : i64, tpu.core_type = #tpu.core_type<tc>, window_params = [{pipeline_mode = #tpu.pipeline_mode<synchronous>, transform_indices = @transform_0, window_bounds = array<i64: 16, 128>}, {pipeline_mode = #tpu.pipeline_mode<synchronous>, transform_indices = @transform_1, window_bounds = array<i64: 16, 128>}, {transform_indices = @transform_2, window_bounds = array<i64: 128, 128>}, {transform_indices = @transform_3, window_bounds = array<i64: 1, 16, 1>}, {transform_indices = @transform_4, window_bounds = array<i64: 1, 16, 1>}]} {
    %c0_i32 = arith.constant 0 : i32
    %0 = arith.cmpi eq, %arg1, %c0_i32 : i32
    %1 = arith.extui %0 : i1 to i32
    %c0_i32_0 = arith.constant 0 : i32
    %2 = arith.cmpi ne, %1, %c0_i32_0 : i32
    scf.if %2 {
      %cst_18 = arith.constant 0xFF800000 : f32
      %37 = vector.broadcast %cst_18 : f32 to vector<16x1xf32>
      %c0_19 = arith.constant 0 : index
      %c0_20 = arith.constant 0 : index
      %38 = vector.load %arg7[%c0_19, %c0_20] : memref<16x1xf32, #tpu.memory_space<vmem>>, vector<16x1xf32>
      tpu.vector_store %arg7[%c0_19, %c0_20], %37 {strides = array<i32>} : memref<16x1xf32, #tpu.memory_space<vmem>>, vector<16x1xf32>,
      %cst_21 = arith.constant 0.000000e+00 : f32
      %39 = vector.broadcast %cst_21 : f32 to vector<16x1xf32>
      %c0_22 = arith.constant 0 : index
      %c0_23 = arith.constant 0 : index
      %40 = vector.load %arg8[%c0_22, %c0_23] : memref<16x1xf32, #tpu.memory_space<vmem>>, vector<16x1xf32>
      tpu.vector_store %arg8[%c0_22, %c0_23], %39 {strides = array<i32>} : memref<16x1xf32, #tpu.memory_space<vmem>>, vector<16x1xf32>,
    } else {
    }
    %c0 = arith.constant 0 : index
    %c0_1 = arith.constant 0 : index
    %3 = vector.load %arg2[%c0, %c0_1] : memref<16x128xbf16, #tpu.memory_space<vmem>>, vector<16x128xbf16>
    %c0_2 = arith.constant 0 : index
    %c0_3 = arith.constant 0 : index
    %4 = vector.load %arg4[%c0_2, %c0_3] : memref<128x128xbf16, #tpu.memory_space<vmem>>, vector<128x128xbf16>
    %cst = arith.constant dense<0.000000e+00> : vector<16x128xf32>
    %5 = tpu.matmul %3, %4, %cst {dimension_numbers = #tpu.dot_dimension_numbers<[1], [0], [0], [1], [0, 0, 1, 1], [], []>} : vector<16x128xbf16>, vector<128x128xbf16>, vector<16x128xf32> -> vector<16x128xf32>
    %c1_i32 = arith.constant 1 : i32
    %6 = arith.muli %arg0, %c1_i32 : i32
    %7 = arith.addi %6, %arg1 : i32
    %c128_i32 = arith.constant 128 : i32
    %8 = arith.muli %7, %c128_i32 : i32
    %9 = tpu.iota {dimensions = array<i32: 1>} : vector<16x128xi32>
    %10 = vector.broadcast %8 : i32 to vector<16x128xi32>
    %11 = arith.addi %10, %9 : vector<16x128xi32>
    %c8_i32 = arith.constant 8 : i32
    %12 = vector.broadcast %c8_i32 : i32 to vector<16x128xi32>
    %13 = arith.cmpi slt, %11, %12 : vector<16x128xi32>
    %cst_4 = arith.constant 0xFF800000 : f32
    %14 = vector.broadcast %cst_4 : f32 to vector<16x128xf32>
    %15 = arith.select %13, %5, %14 : vector<16x128xi1>, vector<16x128xf32>
    %c0_5 = arith.constant 0 : index
    %c0_6 = arith.constant 0 : index
    %16 = vector.load %arg7[%c0_5, %c0_6] : memref<16x1xf32, #tpu.memory_space<vmem>>, vector<16x1xf32>
    %cst_7 = arith.constant dense<0xFF800000> : vector<16xf32>
    %17 = vector.multi_reduction <maximumf>, %15, %cst_7 [1] : vector<16x128xf32> to vector<16xf32>
    %18 = vector.shape_cast %17 : vector<16xf32> to vector<16x1xf32>
    %19 = arith.maximumf %16, %18 : vector<16x1xf32>
    %cst_8 = arith.constant -1.000000e+30 : f32
    %20 = vector.broadcast %cst_8 : f32 to vector<16x1xf32>
    %21 = arith.maximumf %19, %20 : vector<16x1xf32>
    %c0_9 = arith.constant 0 : index
    %c0_10 = arith.constant 0 : index
    %22 = vector.load %arg8[%c0_9, %c0_10] : memref<16x1xf32, #tpu.memory_space<vmem>>, vector<16x1xf32>
    %23 = arith.subf %16, %21 : vector<16x1xf32>
    %24 = math.exp %23 : vector<16x1xf32>
    %25 = arith.mulf %22, %24 : vector<16x1xf32>
    %26 = vector.broadcast %21 : vector<16x1xf32> to vector<16x128xf32>
    %27 = arith.subf %15, %26 : vector<16x128xf32>
    %28 = math.exp %27 : vector<16x128xf32>
    %cst_11 = arith.constant dense<0.000000e+00> : vector<16xf32>
    %29 = vector.multi_reduction <add>, %28, %cst_11 [1] : vector<16x128xf32> to vector<16xf32>
    %30 = vector.shape_cast %29 : vector<16xf32> to vector<16x1xf32>
    %31 = arith.addf %25, %30 : vector<16x1xf32>
    %c0_12 = arith.constant 0 : index
    %c0_13 = arith.constant 0 : index
    %32 = vector.load %arg8[%c0_12, %c0_13] : memref<16x1xf32, #tpu.memory_space<vmem>>, vector<16x1xf32>
    tpu.vector_store %arg8[%c0_12, %c0_13], %31 {strides = array<i32>} : memref<16x1xf32, #tpu.memory_space<vmem>>, vector<16x1xf32>,
    %c0_14 = arith.constant 0 : index
    %c0_15 = arith.constant 0 : index
    %33 = vector.load %arg7[%c0_14, %c0_15] : memref<16x1xf32, #tpu.memory_space<vmem>>, vector<16x1xf32>
    tpu.vector_store %arg7[%c0_14, %c0_15], %21 {strides = array<i32>} : memref<16x1xf32, #tpu.memory_space<vmem>>, vector<16x1xf32>,
    %c0_i32_16 = arith.constant 0 : i32
    %34 = arith.cmpi eq, %arg1, %c0_i32_16 : i32
    %35 = arith.extui %34 : i1 to i32
    %c0_i32_17 = arith.constant 0 : i32
    %36 = arith.cmpi ne, %35, %c0_i32_17 : i32
    scf.if %36 {
      %c0_18 = arith.constant 0 : index
      %c0_19 = arith.constant 0 : index
      %37 = vector.load %arg7[%c0_18, %c0_19] : memref<16x1xf32, #tpu.memory_space<vmem>>, vector<16x1xf32>
      %c0_20 = arith.constant 0 : index
      %c0_21 = arith.constant 0 : index
      %38 = vector.load %arg8[%c0_20, %c0_21] : memref<16x1xf32, #tpu.memory_space<vmem>>, vector<16x1xf32>
      %39 = math.log %38 : vector<16x1xf32>
      %40 = arith.addf %37, %39 : vector<16x1xf32>
      %41 = vector.shape_cast %40 : vector<16x1xf32> to vector<1x16x1xf32>
      %c0_22 = arith.constant 0 : index
      %c0_23 = arith.constant 0 : index
      %c0_24 = arith.constant 0 : index
      %42 = vector.load %arg5[%c0_22, %c0_23, %c0_24] : memref<1x16x1xf32, #tpu.memory_space<vmem>>, vector<1x16x1xf32>
      tpu.vector_store %arg5[%c0_22, %c0_23, %c0_24], %41 {strides = array<i32>} : memref<1x16x1xf32, #tpu.memory_space<vmem>>, vector<1x16x1xf32>,
      %c0_25 = arith.constant 0 : index
      %c0_26 = arith.constant 0 : index
      %43 = vector.load %arg3[%c0_25, %c0_26] : memref<16x128xbf16, #tpu.memory_space<vmem>>, vector<16x128xbf16>
      %44 = arith.extf %43 : vector<16x128xbf16> to vector<16x128xf32>
      %45 = arith.extf %3 : vector<16x128xbf16> to vector<16x128xf32>
      %46 = arith.mulf %44, %45 : vector<16x128xf32>
      %cst_27 = arith.constant dense<0.000000e+00> : vector<16xf32>
      %47 = vector.multi_reduction <add>, %46, %cst_27 [1] : vector<16x128xf32> to vector<16xf32>
      %48 = vector.shape_cast %47 : vector<16xf32> to vector<16x1xf32>
      %49 = vector.shape_cast %48 : vector<16x1xf32> to vector<1x16x1xf32>
      %c0_28 = arith.constant 0 : index
      %c0_29 = arith.constant 0 : index
      %c0_30 = arith.constant 0 : index
      %50 = vector.load %arg6[%c0_28, %c0_29, %c0_30] : memref<1x16x1xf32, #tpu.memory_space<vmem>>, vector<1x16x1xf32>
      tpu.vector_store %arg6[%c0_28, %c0_29, %c0_30], %49 {strides = array<i32>} : memref<1x16x1xf32, #tpu.memory_space<vmem>>, vector<1x16x1xf32>,
    } else {
    }
    return
  }
  func.func @transform_0(%arg0: i32, %arg1: i32) -> (i32, i32) {
    %c0_i32 = arith.constant 0 : i32
    %c0_i32_0 = arith.constant 0 : i32
    %c0_i32_1 = arith.constant 0 : i32
    return %c0_i32, %c0_i32_0 : i32, i32
  }
  func.func @transform_1(%arg0: i32, %arg1: i32) -> (i32, i32) {
    %c0_i32 = arith.constant 0 : i32
    %c0_i32_0 = arith.constant 0 : i32
    %c0_i32_1 = arith.constant 0 : i32
    return %c0_i32, %c0_i32_0 : i32, i32
  }
  func.func @transform_2(%arg0: i32, %arg1: i32) -> (i32, i32) {
    %c1_i32 = arith.constant 1 : i32
    %0 = arith.muli %arg0, %c1_i32 : i32
    %1 = arith.addi %0, %arg1 : i32
    %c0_i32 = arith.constant 0 : i32
    %c0_i32_0 = arith.constant 0 : i32
    return %c0_i32, %1 : i32, i32
  }
  func.func @transform_3(%arg0: i32, %arg1: i32) -> (i32, i32, i32) {
    %c0_i32 = arith.constant 0 : i32
    %c0_i32_0 = arith.constant 0 : i32
    %c0_i32_1 = arith.constant 0 : i32
    return %arg0, %c0_i32, %c0_i32_0 : i32, i32, i32
  }
  func.func @transform_4(%arg0: i32, %arg1: i32) -> (i32, i32, i32) {
    %c0_i32 = arith.constant 0 : i32
    %c0_i32_0 = arith.constant 0 : i32
    %c0_i32_1 = arith.constant 0 : i32
    return %arg0, %c0_i32, %c0_i32_0 : i32, i32, i32
  }
}

</mosaic_0001>

<bundles_post_ra>
// kernel: tpu_custom_call.1
= control target key start
LH: loop header
LB: loop body
LE: loop exit
PB: predicated region body
PF: predicated region fallthrough
CT: control target
= control target key end

     0   :  { %10 = vsyncpa [#allocation5], 0  ;;  %s470_s0 = inlined_call_operand.hbm [shape: bf16[16,128], index: 0, kind: input, shape index: {}]   ;;  %s471_s1 = inlined_call_operand.hbm [shape: bf16[16,128], index: 1, kind: input, shape index: {}]   ;;  %s472_s2 = inlined_call_operand.hbm [shape: bf16[128,128], index: 2, kind: input, shape index: {}]   ;;  %s473_s3 = inlined_call_operand.vmem [shape: f32[1,16,1], index: 3, kind: output, shape index: {0}]   ;;  %s474_s4 = inlined_call_operand.vmem [shape: f32[1,16,1], index: 4, kind: output, shape index: {1}]  }
   0x1   :  { %11 = vsyncpa [#allocation7], 0  ;;  %s29_s17 = sshll.u32 %s471_s1, 4  ;;  %s404_s18 = smov [#allocation6]   ;;  %s30_s17 = int_to_ptr.hbm [resolvable:$true] %s29_s17 }
   0x2   :  { %s31_s19 = sshll.u32 %s404_s18, 4  ;;  %s16_s22 = sshll.u32 %s470_s0, 4  ;;  %s32_s19 = int_to_ptr.vmem [resolvable:$true] %s31_s19  ;;  %s17_s22 = int_to_ptr.hbm [resolvable:$true] %s16_s22 }
   0x3   :  { %s405_s23 = smov 64   ;;  %s406_s24 = smov 4  }
   0x4   :  { %37 = dma.hbm_to_vmem [thread:$0]  %s30_s17, 128, %s32_s19, [#allocation7], %s405_s23, %s405_s23, %s406_s24  }
   0x5   :  { %s407_s25 = smov [#allocation4]   ;;  %s45_s29 = sshll.u32 %s472_s2, 4  ;;  %s46_s29 = int_to_ptr.hbm [resolvable:$true] %s45_s29 }
   0x6   :  { %s18_s26 = sshll.u32 %s407_s25, 4  ;;  %s408_s1 = smov [#allocation8]   ;;  %s19_s26 = int_to_ptr.vmem [resolvable:$true] %s18_s26 }
   0x7   :  { %24 = dma.hbm_to_vmem [thread:$0]  %s17_s22, 128, %s19_s26, [#allocation5], %s405_s23, %s405_s23, %s406_s24  }
   0x8   :  { %s47_s30 = sshll.u32 %s408_s1, 4  ;;  %s48_s30 = int_to_ptr.vmem [resolvable:$true] %s47_s30 }
   0x9   :  { %53 = dma.hbm_to_vmem [thread:$0]  %s46_s29, 1024, %s48_s30, [#allocation7], %s405_s23, %s405_s23, %s406_s24  }
   0xa   :  { %400 = dma.done.wait [#allocation5], 128  }
   0xb   :  { %401 = vsyncadd [#allocation5], 4294967168 }
   0xc   :  { %402 = dma.done.wait [#allocation7], 1152  }
   0xd   :  { %403 = vsyncadd [#allocation7], 4294966144  ;;  %v301_v0 = vld [vmem:[#allocation8 + $0x38] sm:$0xff]  ;;  %v300_v1 = vld [vmem:[#allocation8 + $0x30] sm:$0xff]  ;;  %vm71_vm0 = vcmask 7168   ;;  %v409_v9 = vmov -inf   ;;  %v164_v10 = vlaneseq }
   0xe   :  { %148 = vmatpush.bf16.msra.mxu0 %v301_v0  ;;  %v299_v2 = vld [vmem:[#allocation8 + $0x28] sm:$0xff]  ;;  %v298_v3 = vld [vmem:[#allocation8 + $0x20] sm:$0xff]  ;;  %v297_v4 = vld [vmem:[#allocation8 + $0x18] sm:$0xff]  ;;  %72 = vst.msk [vmem:[#allocation2] sm:$0xff] %vm71_vm0, %v409_v9  ;;  %v410_v16 = vmov 0   ;;  %v411_v17 = vmov 0.0  }
   0xf   :  { %v296_v5 = vld [vmem:[#allocation8 + $0x10] sm:$0xff]  ;;  %v295_v6 = vld [vmem:[#allocation8 + $0x8] sm:$0xff]  ;;  %v294_v7 = vld [vmem:[#allocation8] sm:$0xff]  ;;  %73 = vst.msk [vmem:[#allocation2 + $0x8] sm:$0xff] %vm71_vm0, %v409_v9  ;;  %v165_v11 = vand.u32 127, %v164_v10  ;;  %314 = vset.pattern.permute.xlu1 %v410_v16  ;;  %315 = vset.pattern.permute.xlu0 %v410_v16 }
  0x10   :  { %v293_v8 = vld [vmem:[#allocation4] sm:$0xff]  ;;  %74 = vst.msk [vmem:[#allocation3] sm:$0xff] %vm71_vm0, %v411_v17  ;;  %v303_v29 = vld [vmem:[#allocation6] sm:$0xff]  }
  0x11   :  { %vm168_vm1 = vcmp.lt.s32.totalorder %v165_v11, 8  ;;  %75 = vst.msk [vmem:[#allocation3 + $0x8] sm:$0xff] %vm71_vm0, %v411_v17  ;;  %v76_v28 = vld [vmem:[#allocation4] sm:$0xff]   ;;  %v304_v30 = vunpack.c.l.bf16 %v303_v29  ;;  %v305_v32 = vunpack.c.h.bf16 %v303_v29 }
  0x12   :  { %149 = vmatpush.bf16.msra.mxu0 %v300_v1  ;;  %v237_v31 = vunpack.c.l.bf16 %v76_v28  ;;  %v238_v33 = vunpack.c.h.bf16 %v76_v28 }
  0x14   :  { %v239_v34 = vmul.f32 %v304_v30, %v237_v31  ;;  %v240_v35 = vmul.f32 %v305_v32, %v238_v33 }
  0x15   :  { %v171_v18 = vld [vmem:[#allocation2] sm:$0xff] }
  0x16   :  { %150 = vmatpush.bf16.msra.mxu0 %v299_v2  ;;  %v172_v23 = vld [vmem:[#allocation2 + $0x8] sm:$0xff] }
  0x17   :  { %v181_v47 = vld [vmem:[#allocation3] sm:$0xff] }
  0x18   :  { %v182_v54 = vld [vmem:[#allocation3 + $0x8] sm:$0xff] }
  0x1a   :  { %151 = vmatpush.bf16.msra.mxu0 %v298_v3 }
  0x1e   :  { %152 = vmatpush.bf16.msra.mxu0 %v297_v4 }
  0x22   :  { %153 = vmatpush.bf16.msra.mxu0 %v296_v5 }
  0x26   :  { %154 = vmatpush.bf16.msra.mxu0 %v295_v6 }
  0x2a   :  { %155 = vmatpush.bf16.msra.mxu0 %v294_v7 }
  0x2d   :  { %156 = vmatmul.bf16.vlgmr.msra.gmra.mxu0 %v293_v8 }
  0xaa   :  { %v157_v12 = vpop.f32.mrf.mxu0 }
  0xab   :  { %v169_v13 = vsel %vm168_vm1, %v157_v12, -inf }
  0xac   :  { %173 = vmax.xlane.f32.xlu0 %v169_v13 }
  0xb2   :  { %v159_v14 = vpop.f32.mrf.mxu0 }
  0xb3   :  { %v170_v15 = vsel %vm168_vm1, %v159_v14, -inf }
  0xb4   :  { %175 = vmax.xlane.f32.xlu0 %v170_v15 }
  0xbc   :  { %241 = vadd.xlane.f32.xlu0 %v239_v34 }
 0x11f   :  { %v174_v19 = vpop.xlane.xlu0 %173 }
 0x120   :  { %v177_v20 = vmax.f32 %v171_v18, %v174_v19 }
 0x122   :  { %v179_v21 = vmax.f32 %v177_v20, -1e+30 }
 0x124   :  { %v183_v22 = vsub.f32 %v171_v18, %v179_v21  ;;  %216 = vst.msk [vmem:[#allocation2] sm:$0xff] %vm71_vm0, %v179_v21  ;;  %193 = vperm.xlu1 %314, %v179_v21  }
 0x126   :  { %v185_v44 = vmul.f32 1.442695, %v183_v22 }
 0x127   :  { %v176_v24 = vpop.xlane.xlu0 %175 }
 0x128   :  { %v178_v25 = vmax.f32 %v172_v23, %v176_v24 }
 0x12a   :  { %v180_v26 = vmax.f32 %v178_v25, -1e+30 }
 0x12b   :  { %v221_v62 = vld [vmem:[#allocation2] sm:$0xff] }
 0x12c   :  { %v184_v27 = vsub.f32 %v172_v23, %v180_v26  ;;  %217 = vst.msk [vmem:[#allocation2 + $0x8] sm:$0xff] %vm71_vm0, %v180_v26  ;;  %198 = vperm.xlu1 %314, %v180_v26  }
 0x12e   :  { %v187_v45 = vmul.f32 1.442695, %v184_v27 }
 0x12f   :  { %v242_v48 = vpop.xlane.xlu0 %241 }
 0x130   :  { %245 = vst.msk [vmem:[%s474_s4] sm:$0xff] %vm71_vm0, %v242_v48 }
 0x133   :  { %v222_v2 = vld [vmem:[#allocation2 + $0x8] sm:$0xff] }
 0x156   :  { %243 = vadd.xlane.f32.xlu1 %v240_v35 }
 0x196   :  { %v194_v36 = vpop.permute.xlu1 %193 }
 0x197   :  { %v201_v37 = vsub.f32 %v169_v13, %v194_v36 }
 0x199   :  { %v203_v38 = vmul.f32 1.442695, %v201_v37 }
 0x19b   :  { %316 = vpow2.f32 %v203_v38 }
 0x19e   :  { %v199_v39 = vpop.permute.xlu1 %198 }
 0x19f   :  { %v202_v40 = vsub.f32 %v170_v15, %v199_v39 }
 0x1a1   :  { %v317_v41 = vpop.eup %316  ;;  %v205_v42 = vmul.f32 1.442695, %v202_v40 }
 0x1a2   :  { %207 = vadd.xlane.f32.xlu2 %v317_v41 }
 0x1a3   :  { %318 = vpow2.f32 %v205_v42 }
 0x1a4   :  { %320 = vpow2.f32 %v185_v44 }
 0x1a5   :  { %322 = vpow2.f32 %v187_v45 }
 0x1a9   :  { %v319_v43 = vpop.eup %318 }
 0x1aa   :  { %209 = vadd.xlane.f32.xlu2 %v319_v43  ;;  %v321_v46 = vpop.eup %320 }
 0x1ab   :  { %v189_v50 = vmul.f32 %v321_v46, %v181_v47  ;;  %v323_v53 = vpop.eup %322 }
 0x1ac   :  { %v190_v55 = vmul.f32 %v323_v53, %v182_v54 }
 0x1c9   :  { %v244_v49 = vpop.xlane.xlu1 %243 }
 0x1ca   :  { %246 = vst.msk [vmem:[%s474_s4 + $0x8] sm:$0xff] %vm71_vm0, %v244_v49 }
 0x215   :  { %v208_v51 = vpop.xlane.xlu2 %207 }
 0x216   :  { %v211_v52 = vadd.f32 %v208_v51, %v189_v50 }
 0x218   :  { %214 = vst.msk [vmem:[#allocation3] sm:$0xff] %vm71_vm0, %v211_v52 }
 0x21d   :  { %v210_v56 = vpop.xlane.xlu2 %209 }
 0x21e   :  { %v212_v57 = vadd.f32 %v210_v56, %v190_v55 }
 0x21f   :  { %v223_v58 = vld [vmem:[#allocation3] sm:$0xff] }
 0x220   :  { %324 = vlog2.f32 %v223_v58  ;;  %215 = vst.msk [vmem:[#allocation3 + $0x8] sm:$0xff] %vm71_vm0, %v212_v57 }
 0x226   :  { %v325_v59 = vpop.eup %324 }
 0x227   :  { %v226_v60 = vmul.f32 0.6931472, %v325_v59  ;;  %v224_v61 = vld [vmem:[#allocation3 + $0x8] sm:$0xff] }
 0x228   :  { %326 = vlog2.f32 %v224_v61 }
 0x229   :  { %v229_v63 = vadd.f32 %v226_v60, %v221_v62 }
 0x22b   :  { %231 = vst.msk [vmem:[%s473_s3] sm:$0xff] %vm71_vm0, %v229_v63 }
 0x22e   :  { %v327_v0 = vpop.eup %326 }
 0x22f   :  { %v228_v1 = vmul.f32 0.6931472, %v327_v0 }
 0x231   :  { %v230_v3 = vadd.f32 %v228_v1, %v222_v2 }
 0x233   :  { %232 = vst.msk [vmem:[%s473_s3 + $0x8] sm:$0xff] %vm71_vm0, %v230_v3 }
 0x234   :  { %255 = vsyncpa [#allocation5], 1 }
 0x235   :  { %256 = vsyncpa [#allocation7], 1 }

</bundles_post_ra>
